<compile_context>
chip_gen: v6e
topology: v6e:2x2x1
jax: 0.10.0
libtpu: 0.0.40
codegen_flags: <defaults>
</compile_context>

<pallas_src>
import functools

import jax
import jax.numpy as jnp
from jax.experimental import pallas as pl
from jax.experimental.pallas import tpu as pltpu


def _coupling_kernel(zT_ref, ldjT_ref, maskT_ref,
                     w1mT_ref, b1T_ref, w2T_ref, b2T_ref,
                     w3tsT_ref, b3tsT_ref,
                     zT_out_ref, ldjT_out_ref):
    zT = zT_ref[...]                    # (C, TB) f32, batch on lanes
    maskT = maskT_ref[...]              # (C, 1), broadcasts over the batch lanes
    C = zT_ref.shape[0]
    mm_dtype = w1mT_ref.dtype           # f32 or bf16 (perf path); accum stays f32

    # h1^T = relu(w1m^T @ z^T + b1^T)   -- input mask pre-folded into w1m
    h = jnp.dot(w1mT_ref[...], zT.astype(mm_dtype),
                preferred_element_type=jnp.float32) + b1T_ref[...]
    h = jnp.maximum(h, 0.0)
    # h2^T = relu(w2^T @ h1^T + b2^T)
    h = jnp.dot(w2T_ref[...], h.astype(mm_dtype),
                preferred_element_type=jnp.float32) + b2T_ref[...]
    h = jnp.maximum(h, 0.0)
    # Fused (w3-folded) heads: [translation | scale_pre]^T = w3ts^T @ h2^T + b3ts^T
    ts = jnp.dot(w3tsT_ref[...], h.astype(mm_dtype),
                 preferred_element_type=jnp.float32) + b3tsT_ref[...]
    translation = ts[:C, :]             # sublane-aligned slices (C = 16 = 2*8)
    scale = jnp.tanh(ts[C:, :])

    leftover = zT * maskT               # z * self.mask (output blend only)
    inv_mask = 1.0 - maskT
    # forward (reverse=False) branch of the coupling transform
    zT_out_ref[...] = leftover + inv_mask * (zT * jnp.exp(scale) + translation)
    # ldj += sum((1 - mask) * scale, dim=features)  -> (1, TB) row
    ldjT_out_ref[...] = ldjT_ref[...] + jnp.sum(inv_mask * scale, axis=0,
                                                keepdims=True)
    # TODO(synk): reverse=True branch not wired up (inference-only forward here).


def _pick_block_b(B, target=1024):
    """Batch tile: multiple of 128 (full lane width), <= target, and leaving
    >= 4 grid steps when the batch allows (v7x dual TensorCores)."""
    if B <= 128:
        return B
    cap = max(128, min(target, B // 4))
    cap = (cap // 128) * 128
    tb = cap
    while tb >= 128:
        if B % tb == 0:
            return tb
        tb -= 128
    return B


def pack_params(params, mask, use_bf16=False):
    """One-time parameter packing:
       * fold the input mask into w1 (z*mask @ w1 == z @ (mask[:,None]*w1)),
       * fuse translation|scale heads AND fold w3 into them (no nonlinearity
         after the third Linear),
       * transpose everything for the lane-dense x^T = W^T @ z^T layout,
       * optionally cast all matmul weights to bf16 (after the f32 fold)."""
    C, H = params["w1"].shape
    w1m = mask.reshape(C, 1) * params["w1"]                        # (C, H)
    wts = jnp.concatenate([params["wt"], params["ws"]], axis=1)    # (H, 2C)
    bts = jnp.concatenate([params["bt"], params["bs"]], axis=1)    # (1, 2C)
    # Exact algebraic fold, computed in f32 before any bf16 cast.
    w3ts = params["w3"] @ wts                                      # (H, 2C)
    b3ts = params["b3"] @ wts + bts                                # (1, 2C)

    w1mT = w1m.T                                                   # (H, C)
    w2T = params["w2"].T                                           # (H, H)
    w3tsT = w3ts.T                                                 # (2C, H)
    if use_bf16:
        w1mT = w1mT.astype(jnp.bfloat16)
        w2T = w2T.astype(jnp.bfloat16)
        w3tsT = w3tsT.astype(jnp.bfloat16)

    return dict(
        maskT=mask.reshape(C, 1),
        w1mT=w1mT, b1T=params["b1"].reshape(H, 1),
        w2T=w2T, b2T=params["b2"].reshape(H, 1),
        w3tsT=w3tsT, b3tsT=b3ts.reshape(2 * C, 1),
    )


@functools.partial(jax.jit, static_argnames=("block_b",))
def coupling_forward(z, ldj, packed, block_b=None):
    """z: (B, C) f32, ldj: (B,) f32, packed: pack_params(...)."""
    B, C = z.shape
    H = packed["w1mT"].shape[0]

    # Pad the batch to a multiple of 128 so tiles are lane-dense.
    B_pad = ((B + 127) // 128) * 128
    if B_pad != B:
        z = jnp.pad(z, ((0, B_pad - B), (0, 0)))
        ldj = jnp.pad(ldj, (0, B_pad - B))

    TB = block_b if block_b is not None else _pick_block_b(B_pad)
    assert B_pad % TB == 0

    # Transposed, lane-dense presentation: batch -> lanes, features -> sublanes.
    zT = z.T                       # (C, B_pad)
    ldjT = ldj.reshape(1, B_pad)   # (1, B_pad)

    tile_map = lambda i: (0, i)
    const_map = lambda i: (0, 0)
    zT_spec = pl.BlockSpec((C, TB), tile_map)
    ldjT_spec = pl.BlockSpec((1, TB), tile_map)
    resident = lambda shape: pl.BlockSpec(shape, const_map)  # weights stay in VMEM

    weight_bytes = sum(int(v.size) * v.dtype.itemsize for v in packed.values())
    cost = pl.CostEstimate(
        flops=2 * B_pad * (C * H + H * H + 2 * H * C),   # w3 folded: 3 dots
        transcendentals=2 * B_pad * C,                   # exp + tanh per feature
        bytes_accessed=4 * (2 * B_pad * C + 2 * B_pad) + weight_bytes,
    )

    zT_out, ldjT_out = pl.pallas_call(
        _coupling_kernel,
        out_shape=(
            jax.ShapeDtypeStruct((C, B_pad), jnp.float32),
            jax.ShapeDtypeStruct((1, B_pad), jnp.float32),
        ),
        grid=(B_pad // TB,),
        in_specs=[
            zT_spec,                                        # z^T      (tiled)
            ldjT_spec,                                      # ldj^T    (tiled)
            resident((C, 1)),                               # mask^T
            resident((H, C)), resident((H, 1)),             # w1m^T, b1^T
            resident((H, H)), resident((H, 1)),             # w2^T, b2^T
            resident((2 * C, H)), resident((2 * C, 1)),     # fused (w3@[wt|ws])^T, bias^T
        ],
        out_specs=(zT_spec, ldjT_spec),
        compiler_params=pltpu.CompilerParams(
            dimension_semantics=("parallel",)),             # megacore over batch tiles
        cost_estimate=cost,
    )(zT, ldjT, packed["maskT"],
      packed["w1mT"], packed["b1T"],
      packed["w2T"], packed["b2T"],
      packed["w3tsT"], packed["b3tsT"])

    z_out = zT_out.T[:B]
    ldj_out = ldjT_out.reshape(B_pad)[:B]
    return z_out, ldj_out


def init_coupling_params(key, c_in, n_hidden, zero_last=True):
    """nn.Linear-style init (uniform +/- 1/sqrt(fan_in)); optionally zero the
    last layer of self.nn exactly as in Coupling.__init__.  Weights stored
    transposed relative to PyTorch: shape (in, out)."""
    def linear(k, fan_in, fan_out):
        kw, kb = jax.random.split(k)
        bound = 1.0 / jnp.sqrt(fan_in)
        w = jax.random.uniform(kw, (fan_in, fan_out), jnp.float32, -bound, bound)
        b = jax.random.uniform(kb, (1, fan_out), jnp.float32, -bound, bound)
        return w, b

    keys = jax.random.split(key, 5)
    w1, b1 = linear(keys[0], c_in, n_hidden)
    w2, b2 = linear(keys[1], n_hidden, n_hidden)
    w3, b3 = linear(keys[2], n_hidden, n_hidden)
    if zero_last:
        # self.nn[-1].weight.data.zero_(); self.nn[-1].bias.data.zero_()
        w3 = jnp.zeros_like(w3)
        b3 = jnp.zeros_like(b3)
    wt, bt = linear(keys[3], n_hidden, c_in)
    ws, bs = linear(keys[4], n_hidden, c_in)
    return dict(w1=w1, b1=b1, w2=w2, b2=b2, w3=w3, b3=b3,
                wt=wt, bt=bt, ws=ws, bs=bs)


def coupling_forward_ref(z, ldj, mask, p):
    """Pure-JAX reference of the PyTorch forward (reverse=False)."""
    leftover = z * mask
    h = jnp.maximum(leftover @ p["w1"] + p["b1"], 0.0)
    h = jnp.maximum(h @ p["w2"] + p["b2"], 0.0)
    temp = h @ p["w3"] + p["b3"]
    translation = temp @ p["wt"] + p["bt"]
    scale = jnp.tanh(temp @ p["ws"] + p["bs"])
    inv = 1.0 - mask
    z_out = leftover + inv * (z * jnp.exp(scale) + translation)
    ldj_out = ldj + jnp.sum(inv * scale, axis=1)
    return z_out, ldj_out


if __name__ == "__main__":
    # Small shapes: batch=1024, c_in=16, n_hidden=128.
    # _pick_block_b -> TB=256 (lane-dense, grid of 4 for v7x's 2 TensorCores).
    B, C, H = 1024, 16, 128

    key = jax.random.PRNGKey(0)
    k_z, k_ldj, k_p, k_p2 = jax.random.split(key, 4)

    z = jax.random.normal(k_z, (B, C), jnp.float32)
    ldj = jax.random.normal(k_ldj, (B,), jnp.float32)
    mask = (jnp.arange(C) % 2).astype(jnp.float32)   # checkerboard feature mask
    mask_row = mask.reshape(1, C)

    # 1) Module-faithful init (last nn layer zeroed), f32 path, tight tolerance.
    params = init_coupling_params(k_p, C, H, zero_last=True)
    packed = pack_params(params, mask)
    z_out, ldj_out = coupling_forward(z, ldj, packed)
    jax.block_until_ready((z_out, ldj_out))
    z_ref, ldj_ref = coupling_forward_ref(z, ldj, mask_row, params)
    assert z_out.shape == (B, C) and ldj_out.shape == (B,)
    assert jnp.allclose(z_out, z_ref, atol=1e-5, rtol=1e-5)
    assert jnp.allclose(ldj_out, ldj_ref, atol=1e-5, rtol=1e-5)

    # 2) Non-zero last layer so the hidden-matmul path (and the w3 fold) affect
    #    the output; looser tolerance absorbs MXU vs XLA f32 pass differences.
    params2 = init_coupling_params(k_p2, C, H, zero_last=False)
    packed2 = pack_params(params2, mask)
    z_out2, ldj_out2 = coupling_forward(z, ldj, packed2)
    jax.block_until_ready((z_out2, ldj_out2))
    z_ref2, ldj_ref2 = coupling_forward_ref(z, ldj, mask_row, params2)
    assert jnp.allclose(z_out2, z_ref2, atol=2e-2, rtol=2e-2)
    assert jnp.allclose(ldj_out2, ldj_ref2, atol=2e-2, rtol=2e-2)

    # 3) bf16 perf path (all matmul operands bf16, f32 accumulation/epilogue).
    packed_bf16 = pack_params(params2, mask, use_bf16=True)
    z_out3, ldj_out3 = coupling_forward(z, ldj, packed_bf16)
    jax.block_until_ready((z_out3, ldj_out3))
    assert jnp.allclose(z_out3, z_ref2, atol=1e-1, rtol=1e-1)
    assert jnp.allclose(ldj_out3, ldj_ref2, atol=1e-1, rtol=1e-1)

    # 4) Ragged batch (exercises wrapper zero-padding to a lane-dense multiple).
    Br = 200
    zr, ldjr = z[:Br], ldj[:Br]
    z_out4, ldj_out4 = coupling_forward(zr, ldjr, packed2)
    jax.block_until_ready((z_out4, ldj_out4))
    zr_ref, ldjr_ref = coupling_forward_ref(zr, ldjr, mask_row, params2)
    assert z_out4.shape == (Br, C) and ldj_out4.shape == (Br,)
    assert jnp.allclose(z_out4, zr_ref, atol=2e-2, rtol=2e-2)
    assert jnp.allclose(ldj_out4, ldjr_ref, atol=2e-2, rtol=2e-2)

    print("KERNEL_OK")
</pallas_src>

<mosaic_0001>
module attributes {stable_mosaic.version = 11 : i64} {
  func.func @_coupling_kernel(%arg0: i32, %arg1: memref<16x256xf32, #tpu.memory_space<vmem>>, %arg2: memref<1x256xf32, #tpu.memory_space<vmem>>, %arg3: memref<16x1xf32, #tpu.memory_space<vmem>>, %arg4: memref<128x16xf32, #tpu.memory_space<vmem>>, %arg5: memref<128x1xf32, #tpu.memory_space<vmem>>, %arg6: memref<128x128xf32, #tpu.memory_space<vmem>>, %arg7: memref<128x1xf32, #tpu.memory_space<vmem>>, %arg8: memref<32x128xf32, #tpu.memory_space<vmem>>, %arg9: memref<32x1xf32, #tpu.memory_space<vmem>>, %arg10: memref<16x256xf32, #tpu.memory_space<vmem>>, %arg11: memref<1x256xf32, #tpu.memory_space<vmem>>) attributes {dimension_semantics = [#tpu.dimension_semantics<parallel>], iteration_bounds = array<i64: 4>, scalar_prefetch = 0 : i64, scratch_operands = 0 : i64, tpu.core_type = #tpu.core_type<tc>, window_params = [{transform_indices = @transform_0, window_bounds = array<i64: 16, 256>}, {transform_indices = @transform_1, window_bounds = array<i64: 1, 256>}, {pipeline_mode = #tpu.pipeline_mode<synchronous>, transform_indices = @transform_2, window_bounds = array<i64: 16, 1>}, {pipeline_mode = #tpu.pipeline_mode<synchronous>, transform_indices = @transform_3, window_bounds = array<i64: 128, 16>}, {pipeline_mode = #tpu.pipeline_mode<synchronous>, transform_indices = @transform_4, window_bounds = array<i64: 128, 1>}, {pipeline_mode = #tpu.pipeline_mode<synchronous>, transform_indices = @transform_5, window_bounds = array<i64: 128, 128>}, {pipeline_mode = #tpu.pipeline_mode<synchronous>, transform_indices = @transform_6, window_bounds = array<i64: 128, 1>}, {pipeline_mode = #tpu.pipeline_mode<synchronous>, transform_indices = @transform_7, window_bounds = array<i64: 32, 128>}, {pipeline_mode = #tpu.pipeline_mode<synchronous>, transform_indices = @transform_8, window_bounds = array<i64: 32, 1>}, {transform_indices = @transform_9, window_bounds = array<i64: 16, 256>}, {transform_indices = @transform_10, window_bounds = array<i64: 1, 256>}]} {
    %c0 = arith.constant 0 : index
    %c0_0 = arith.constant 0 : index
    %0 = vector.load %arg1[%c0, %c0_0] : memref<16x256xf32, #tpu.memory_space<vmem>>, vector<16x256xf32>
    %c0_1 = arith.constant 0 : index
    %c0_2 = arith.constant 0 : index
    %1 = vector.load %arg3[%c0_1, %c0_2] : memref<16x1xf32, #tpu.memory_space<vmem>>, vector<16x1xf32>
    %c0_3 = arith.constant 0 : index
    %c0_4 = arith.constant 0 : index
    %2 = vector.load %arg4[%c0_3, %c0_4] : memref<128x16xf32, #tpu.memory_space<vmem>>, vector<128x16xf32>
    %cst = arith.constant dense<0.000000e+00> : vector<128x256xf32>
    %3 = tpu.matmul %2, %0, %cst {dimension_numbers = #tpu.dot_dimension_numbers<[1], [0], [0], [1], [0, 0, 1, 1], [], []>} : vector<128x16xf32>, vector<16x256xf32>, vector<128x256xf32> -> vector<128x256xf32>
    %c0_5 = arith.constant 0 : index
    %c0_6 = arith.constant 0 : index
    %4 = vector.load %arg5[%c0_5, %c0_6] : memref<128x1xf32, #tpu.memory_space<vmem>>, vector<128x1xf32>
    %5 = vector.broadcast %4 : vector<128x1xf32> to vector<128x256xf32>
    %6 = arith.addf %3, %5 : vector<128x256xf32>
    %cst_7 = arith.constant 0.000000e+00 : f32
    %7 = vector.broadcast %cst_7 : f32 to vector<128x256xf32>
    %8 = arith.maximumf %6, %7 : vector<128x256xf32>
    %c0_8 = arith.constant 0 : index
    %c0_9 = arith.constant 0 : index
    %9 = vector.load %arg6[%c0_8, %c0_9] : memref<128x128xf32, #tpu.memory_space<vmem>>, vector<128x128xf32>
    %cst_10 = arith.constant dense<0.000000e+00> : vector<128x256xf32>
    %10 = tpu.matmul %9, %8, %cst_10 {dimension_numbers = #tpu.dot_dimension_numbers<[1], [0], [0], [1], [0, 0, 1, 1], [], []>} : vector<128x128xf32>, vector<128x256xf32>, vector<128x256xf32> -> vector<128x256xf32>
    %c0_11 = arith.constant 0 : index
    %c0_12 = arith.constant 0 : index
    %11 = vector.load %arg7[%c0_11, %c0_12] : memref<128x1xf32, #tpu.memory_space<vmem>>, vector<128x1xf32>
    %12 = vector.broadcast %11 : vector<128x1xf32> to vector<128x256xf32>
    %13 = arith.addf %10, %12 : vector<128x256xf32>
    %cst_13 = arith.constant 0.000000e+00 : f32
    %14 = vector.broadcast %cst_13 : f32 to vector<128x256xf32>
    %15 = arith.maximumf %13, %14 : vector<128x256xf32>
    %c0_14 = arith.constant 0 : index
    %c0_15 = arith.constant 0 : index
    %16 = vector.load %arg8[%c0_14, %c0_15] : memref<32x128xf32, #tpu.memory_space<vmem>>, vector<32x128xf32>
    %cst_16 = arith.constant dense<0.000000e+00> : vector<32x256xf32>
    %17 = tpu.matmul %16, %15, %cst_16 {dimension_numbers = #tpu.dot_dimension_numbers<[1], [0], [0], [1], [0, 0, 1, 1], [], []>} : vector<32x128xf32>, vector<128x256xf32>, vector<32x256xf32> -> vector<32x256xf32>
    %c0_17 = arith.constant 0 : index
    %c0_18 = arith.constant 0 : index
    %18 = vector.load %arg9[%c0_17, %c0_18] : memref<32x1xf32, #tpu.memory_space<vmem>>, vector<32x1xf32>
    %19 = vector.broadcast %18 : vector<32x1xf32> to vector<32x256xf32>
    %20 = arith.addf %17, %19 : vector<32x256xf32>
    %21 = vector.extract_strided_slice %20 {offsets = [0, 0], sizes = [16, 256], strides = [1, 1]} : vector<32x256xf32> to vector<16x256xf32>
    %22 = vector.extract_strided_slice %20 {offsets = [16, 0], sizes = [16, 256], strides = [1, 1]} : vector<32x256xf32> to vector<16x256xf32>
    %23 = math.tanh %22 : vector<16x256xf32>
    %24 = vector.broadcast %1 : vector<16x1xf32> to vector<16x256xf32>
    %25 = arith.mulf %0, %24 : vector<16x256xf32>
    %cst_19 = arith.constant 1.000000e+00 : f32
    %26 = vector.broadcast %cst_19 : f32 to vector<16x1xf32>
    %27 = arith.subf %26, %1 : vector<16x1xf32>
    %28 = math.exp %23 : vector<16x256xf32>
    %29 = arith.mulf %0, %28 : vector<16x256xf32>
    %30 = arith.addf %29, %21 : vector<16x256xf32>
    %31 = vector.broadcast %27 : vector<16x1xf32> to vector<16x256xf32>
    %32 = arith.mulf %31, %30 : vector<16x256xf32>
    %33 = arith.addf %25, %32 : vector<16x256xf32>
    %c0_20 = arith.constant 0 : index
    %c0_21 = arith.constant 0 : index
    %34 = vector.load %arg10[%c0_20, %c0_21] : memref<16x256xf32, #tpu.memory_space<vmem>>, vector<16x256xf32>
    tpu.vector_store %arg10[%c0_20, %c0_21], %33 {strides = array<i32>} : memref<16x256xf32, #tpu.memory_space<vmem>>, vector<16x256xf32>,
    %c0_22 = arith.constant 0 : index
    %c0_23 = arith.constant 0 : index
    %35 = vector.load %arg2[%c0_22, %c0_23] : memref<1x256xf32, #tpu.memory_space<vmem>>, vector<1x256xf32>
    %36 = vector.broadcast %27 : vector<16x1xf32> to vector<16x256xf32>
    %37 = arith.mulf %36, %23 : vector<16x256xf32>
    %cst_24 = arith.constant dense<0.000000e+00> : vector<256xf32>
    %38 = vector.multi_reduction <add>, %37, %cst_24 [0] : vector<16x256xf32> to vector<256xf32>
    %39 = vector.shape_cast %38 : vector<256xf32> to vector<1x256xf32>
    %40 = arith.addf %35, %39 : vector<1x256xf32>
    %c0_25 = arith.constant 0 : index
    %c0_26 = arith.constant 0 : index
    %41 = vector.load %arg11[%c0_25, %c0_26] : memref<1x256xf32, #tpu.memory_space<vmem>>, vector<1x256xf32>
    tpu.vector_store %arg11[%c0_25, %c0_26], %40 {strides = array<i32>} : memref<1x256xf32, #tpu.memory_space<vmem>>, vector<1x256xf32>,
    return
  }
  func.func @transform_0(%arg0: i32) -> (i32, i32) {
    %c0_i32 = arith.constant 0 : i32
    %c0_i32_0 = arith.constant 0 : i32
    return %c0_i32, %arg0 : i32, i32
  }
  func.func @transform_1(%arg0: i32) -> (i32, i32) {
    %c0_i32 = arith.constant 0 : i32
    %c0_i32_0 = arith.constant 0 : i32
    return %c0_i32, %arg0 : i32, i32
  }
  func.func @transform_2(%arg0: i32) -> (i32, i32) {
    %c0_i32 = arith.constant 0 : i32
    %c0_i32_0 = arith.constant 0 : i32
    %c0_i32_1 = arith.constant 0 : i32
    return %c0_i32, %c0_i32_0 : i32, i32
  }
  func.func @transform_3(%arg0: i32) -> (i32, i32) {
    %c0_i32 = arith.constant 0 : i32
    %c0_i32_0 = arith.constant 0 : i32
    %c0_i32_1 = arith.constant 0 : i32
    return %c0_i32, %c0_i32_0 : i32, i32
  }
  func.func @transform_4(%arg0: i32) -> (i32, i32) {
    %c0_i32 = arith.constant 0 : i32
    %c0_i32_0 = arith.constant 0 : i32
    %c0_i32_1 = arith.constant 0 : i32
    return %c0_i32, %c0_i32_0 : i32, i32
  }
  func.func @transform_5(%arg0: i32) -> (i32, i32) {
    %c0_i32 = arith.constant 0 : i32
    %c0_i32_0 = arith.constant 0 : i32
    %c0_i32_1 = arith.constant 0 : i32
    return %c0_i32, %c0_i32_0 : i32, i32
  }
  func.func @transform_6(%arg0: i32) -> (i32, i32) {
    %c0_i32 = arith.constant 0 : i32
    %c0_i32_0 = arith.constant 0 : i32
    %c0_i32_1 = arith.constant 0 : i32
    return %c0_i32, %c0_i32_0 : i32, i32
  }
  func.func @transform_7(%arg0: i32) -> (i32, i32) {
    %c0_i32 = arith.constant 0 : i32
    %c0_i32_0 = arith.constant 0 : i32
    %c0_i32_1 = arith.constant 0 : i32
    return %c0_i32, %c0_i32_0 : i32, i32
  }
  func.func @transform_8(%arg0: i32) -> (i32, i32) {
    %c0_i32 = arith.constant 0 : i32
    %c0_i32_0 = arith.constant 0 : i32
    %c0_i32_1 = arith.constant 0 : i32
    return %c0_i32, %c0_i32_0 : i32, i32
  }
  func.func @transform_9(%arg0: i32) -> (i32, i32) {
    %c0_i32 = arith.constant 0 : i32
    %c0_i32_0 = arith.constant 0 : i32
    return %c0_i32, %arg0 : i32, i32
  }
  func.func @transform_10(%arg0: i32) -> (i32, i32) {
    %c0_i32 = arith.constant 0 : i32
    %c0_i32_0 = arith.constant 0 : i32
    return %c0_i32, %arg0 : i32, i32
  }
}

</mosaic_0001>

<bundles_post_ra>
// kernel: coupling_forward.1
= control target key start
LH: loop header
LB: loop body
LE: loop exit
PB: predicated region body
PF: predicated region fallthrough
CT: control target
= control target key end

     0   :  { %s2280_s0 = inlined_call_operand.vmem [shape: f32[16,1024], index: 0, kind: input, shape index: {}]   ;;  %s2281_s1 = inlined_call_operand.vmem [shape: f32[1,1024], index: 1, kind: input, shape index: {}]   ;;  %s2282_s2 = inlined_call_operand.vmem [shape: f32[16,1], index: 2, kind: input, shape index: {}]   ;;  %s2283_s3 = inlined_call_operand.vmem [shape: f32[128,16], index: 3, kind: input, shape index: {}]   ;;  %s2284_s4 = inlined_call_operand.vmem [shape: f32[128,1], index: 4, kind: input, shape index: {}]   ;;  %s2285_s5 = inlined_call_operand.vmem [shape: f32[128,128], index: 5, kind: input, shape index: {}]   ;;  %s2286_s6 = inlined_call_operand.vmem [shape: f32[128,1], index: 6, kind: input, shape index: {}]   ;;  %s2287_s7 = inlined_call_operand.vmem [shape: f32[32,128], index: 7, kind: input, shape index: {}]   ;;  %s2288_s8 = inlined_call_operand.vmem [shape: f32[32,1], index: 8, kind: input, shape index: {}]   ;;  %s2289_s9 = inlined_call_operand.hbm [shape: f32[16,1024], index: 9, kind: output, shape index: {0}]   ;;  %s2290_s10 = inlined_call_operand.hbm [shape: f32[1,1024], index: 10, kind: output, shape index: {1}]  }
   0x1   :  { %2292 = sst [smem:[#allocation9_spill]] %s2280_s0 }
   0x2   :  { %2293 = sst [smem:[#allocation10_spill]] %s2281_s1 }
   0x3   :  { %2294 = sst [smem:[#allocation11_spill]] %s2282_s2 }
   0x4   :  { %16 = vsyncpa [#allocation4], 0 }
   0x5   :  { %18 = vsyncpa [#allocation4 + $0x1], 0 }
   0x6   :  { %19 = vsyncpa [#allocation6], 0 }
   0x7   :  { %21 = vsyncpa [#allocation6 + $0x1], 0  ;;  %s1707_s13 = smov 0   ;;  %s1709_s14 = smov 0  }
   0x8   :  { %s1711_s15 = smov 0   ;;  %s1713_s16 = smov 0  }
   0x9 LB: > { %s1728_s17 = sadd.s32 4294967295, %s1642_s16   ;;  %s1442_s18 = sadd.s32 4294967294, %s1642_s16   ;;  %s1642_s16 = sphi %s1713_s16, %s2308_s16   ;;  %s1638_s15 = sphi %s1711_s15, %s2307_s15   ;;  %s1634_s14 = sphi %s1709_s14, %s2306_s14   ;;  %s1630_s13 = sphi %s1707_s13, %s2305_s13  }
   0xa   : > { %s1732_s19 = sadd.s32 1, %s1642_s16   ;;  %s34_s20 = sadd.s32 1, %s1638_s15 }
   0xb   : > { %s31_s21 = ssub.s32 %s1642_s16, %s1732_s19  ;;  %p41_p0 = scmp.ne.s32.totalorder %s1638_s15, %s1634_s14 }
   0xc   : > { %p32_p1 = scmp.eq.s32.totalorder %s31_s21, 0  ;;  %p42_p2 = scmp.eq.s32.totalorder %s1642_s16, 0 }
   0xd   : > { %p244_p3 = scmp.eq.s32.totalorder %s1728_s17, 3  ;;  %p249_p4 = scmp.ne.s32.totalorder %s1634_s14, %s1630_s13 }
   0xe   : > { %s1744_s22 = scalar_select %p32_p1, %s1638_s15, %s34_s20  }
   0xf   : > { %p43_p5 = por %p42_p2, %p41_p0  ;;  %p1746_p6 = por %p244_p3, %p41_p0 }
  0x10   : > { %p250_p7 = scmp.eq.s32.totalorder %s1442_s18, 3  ;;  %p1444_p9 = scmp.ge.s32.totalorder %s1642_s16, 4 }
  0x12   : > { %p1750_p8 = por %p250_p7, %p249_p4  ;;  %313 = sbr.rel (%p1444_p9) target bundleno = 35 (0x23), region = 44 }
  0x17   : > { %316 = sbr.rel (!%p43_p5) target bundleno = 35 (0x23), region = 48  ;;  %s318_s25 = sand.u32 (%p43_p5), 1, %s1638_s15  }
  0x18   : > { %s1477_s26 = sshll.u32 (%p43_p5), %s1642_s16, 4  ;;  %s1445_s27 = sshll.u32 (%p43_p5), %s318_s25, 5 }
  0x19   : > { %s2297_s0 = sld [smem:[#allocation9_spill]] (%p43_p5)  ;;  %s320_s11 = scalar_lea.vmem (%p43_p5), [#allocation2], %s1445_s27 }
  0x1f   : > { %s323_s30 = scalar_lea.vmem %s2297_s0, %s1477_s26 }
  0x20   : > { %v336_v0 = vld [vmem:[%s323_s30] sm:$0xff]  ;;  %v338_v1 = vld [vmem:[%s323_s30 + $0x8] sm:$0xff] }
  0x21   : > { %v340_v2 = vld [vmem:[%s323_s30 + $0x40] sm:$0xff]  ;;  %337 = vst [vmem:[%s320_s11] sm:$0xff] %v336_v0  ;;  %339 = vst [vmem:[%s320_s11 + $0x8] sm:$0xff] %v338_v1  ;;  %v342_v3 = vld [vmem:[%s323_s30 + $0x48] sm:$0xff] }
  0x22   : > { %341 = vst [vmem:[%s320_s11 + $0x10] sm:$0xff] %v340_v2  ;;  %343 = vst [vmem:[%s320_s11 + $0x18] sm:$0xff] %v342_v3 }
  0x23 PF: > { %p1448_p10 = scmp.ge.s32.totalorder %s1642_s16, 1  ;;  %p356_p11 = scmp.lt.s32.totalorder %s1642_s16, 5 }
  0x25   : > { %p357_p12 = pnand %p1448_p10, %p356_p11 }
  0x26   : > { %s1763_s12 = sand.u32 (!%p357_p12), 1, %s1634_s14   ;;  %s2298_s2 = sld [smem:[#allocation11_spill]] (!%p357_p12) }
  0x27   : > { %360 = sbr.rel (%p357_p12) target bundleno = 917 (0x395), region = 75  ;;  %s2291_s18 = sshll.u32 (!%p357_p12), %s1763_s12, 5 }
  0x28   : > { %s1770_s20 = scalar_lea.vmem (!%p357_p12), [#allocation2], %s2291_s18  ;;  %s1452_s0 = sshll.u32 (!%p357_p12), %s1728_s17, 1 }
  0x29   : > { %p2157_p13 = scmp.lt.s32.totalorder (!%p357_p12), %s1452_s0, 7  ;;  %s1451_s26 = sshll.u32 (!%p357_p12), %s1763_s12, 1 }
  0x2a   : > { %s2300_s27 = sshll.u32 (!%p357_p12), %s1763_s12, 5  ;;  %s1478_s30 = sshll.u32 (!%p357_p12), %s1728_s17, 8 }
  0x2b   : > { %s2175_s28 = scalar_lea.vmem (!%p357_p12), [#allocation3], %s2300_s27  ;;  %s2301_s1 = sld [smem:[#allocation10_spill]] (!%p357_p12) }
  0x2c   : > { %v1644_v4 = vmov 0.0   ;;  %v1645_v5 = vmov 0   ;;  %v420_v6 = vld [vmem:[%s1770_s20 + $0x18] sm:$0xff]  ;;  %v419_v7 = vld [vmem:[%s1770_s20 + $0x10] sm:$0xff]  ;;  %v418_v8 = vld [vmem:[%s1770_s20 + $0x8] sm:$0xff]  ;;  %vm535_vm0 = vcmask 130048   ;;  %s2192_s27 = scalar_lea.hbm %s2289_s9, %s1478_s30 }
  0x2d   : > { %648 = vmatprep.mubr.f32.mxu0 %v1644_v4  ;;  %953 = vmatprep.mubr.f32.mxu1 %v1644_v4  ;;  %v417_v9 = vld [vmem:[%s1770_s20] sm:$0xff]  ;;  %v452_v11 = vld [vmem:[%s2284_s4 + $0x68] sm:$0xff]  ;;  %v454_v12 = vld [vmem:[%s2284_s4 + $0x78] sm:$0xff]  ;;  %s2310_s0 = smov (!%p2157_p13, %s1452_s0), 7  ;;  %s1319_s29 = sshll.u32 %s2175_s28, 4  ;;  %s2187_s29 = int_to_ptr.vmem [resolvable:$true] %s1319_s29 }
  0x2e   : > { %1531 = vset.pattern.permute.xlu1 %v1645_v5  ;;  %1530 = vset.pattern.permute.xlu0 %v1645_v5  ;;  %v423_v10 = vld [vmem:[%s2283_s3] sm:$0xff]  ;;  %v453_v14 = vld [vmem:[%s2284_s4 + $0x70] sm:$0xff]  ;;  %v424_v15 = vld [vmem:[%s2283_s3 + $0x8] sm:$0xff]  ;;  %s2199_s11 = scalar_lea.vmem [#allocation5], %s1451_s26  ;;  %s1552_s26 = scalar_lea.vmem %s2187_s29, 512 }
  0x2f   : > { %612 = vmatprep.subr.mxu0 %v420_v6  ;;  %522 = vperm.xlu1 %1531, %v452_v11   ;;  %v451_v13 = vld [vmem:[%s2284_s4 + $0x60] sm:$0xff]  ;;  %v449_v16 = vld [vmem:[%s2284_s4 + $0x50] sm:$0xff]  ;;  %v450_v17 = vld [vmem:[%s2284_s4 + $0x58] sm:$0xff]  ;;  %s1336_s21 = sshll.u32 %s2199_s11, 4  ;;  %p1553_p0 = scmp.ne.s32.totalorder %s2187_s29, %s1552_s26  ;;  %s2213_s21 = int_to_ptr.vmem [resolvable:$true] %s1336_s21 }
  0x30   : > { %613 = vmatpush1.msra.mxu0 %v419_v7  ;;  %532 = vperm.xlu0 %1530, %v454_v12   ;;  %v425_v18 = vld [vmem:[%s2283_s3 + $0x10] sm:$0xff]  ;;  %v447_v19 = vld [vmem:[%s2284_s4 + $0x40] sm:$0xff]  ;;  %v448_v20 = vld [vmem:[%s2284_s4 + $0x48] sm:$0xff]  ;;  %s1647_s18 = smov [#allocation3]  }
  0x31   : > { %614 = vmatprep.subr.mxu0 %v418_v8  ;;  %v426_v21 = vld [vmem:[%s2283_s3 + $0x18] sm:$0xff]  ;;  %v445_v22 = vld [vmem:[%s2284_s4 + $0x30] sm:$0xff]  ;;  %v427_v24 = vld [vmem:[%s2283_s3 + $0x20] sm:$0xff]  ;;  %s413_s25 = scalar_lea.vmem %s2301_s1, %s2310_s0  ;;  %s1479_s0 = sshll.u32 %s1728_s17, 5 }
  0x32   : > { %615 = vmatpush1.msra.mxu0 %v417_v9  ;;  %v446_v23 = vld [vmem:[%s2284_s4 + $0x38] sm:$0xff]  ;;  %v443_v25 = vld [vmem:[%s2284_s4 + $0x20] sm:$0xff]  ;;  %v444_v26 = vld [vmem:[%s2284_s4 + $0x28] sm:$0xff]  ;;  %p1554_p1 = pnand %p1553_p0, %p1746_p6  ;;  %s1556_s1 = sshll.u32 %s1647_s18, 4  ;;  %s1557_s1 = int_to_ptr.vmem [resolvable:$false] %s1556_s1 }
  0x33   : > { %1453 = vmatmul.mubr.msk.f32.vlgmr.msra.gmra.mxu0 %vm535_vm0, %v423_v10  ;;  %517 = vperm.xlu1 %1531, %v451_v13   ;;  %v428_v27 = vld [vmem:[%s2283_s3 + $0x28] sm:$0xff]  ;;  %v441_v28 = vld [vmem:[%s2284_s4 + $0x10] sm:$0xff]  ;;  %v442_v29 = vld [vmem:[%s2284_s4 + $0x18] sm:$0xff]  ;;  %p1559_p3 = scmp.lt.s32.totalorder %s2187_s29, %s1557_s1 }
  0x34   : > { %654 = vmatprep.mubr.f32.mxu0 %v1644_v4  ;;  %527 = vperm.xlu0 %1530, %v453_v14   ;;  %v429_v30 = vld [vmem:[%s2283_s3 + $0x30] sm:$0xff]  ;;  %v439_v31 = vld [vmem:[%s2284_s4] sm:$0xff]  ;;  %v440_v32 = vld [vmem:[%s2284_s4 + $0x8] sm:$0xff]  ;;  %p1555_p2 = pneg %p1554_p1 }
  0x35   : > { %v430_v33 = vld [vmem:[%s2283_s3 + $0x38] sm:$0xff]  ;;  %v807_v34 = vld [vmem:[%s2286_s6 + $0x70] sm:$0xff]  ;;  %v431_v36 = vld [vmem:[%s2283_s3 + $0x40] sm:$0xff] }
  0x36   : > { %v808_v35 = vld [vmem:[%s2286_s6 + $0x78] sm:$0xff]  ;;  %v805_v37 = vld [vmem:[%s2286_s6 + $0x60] sm:$0xff]  ;;  %v806_v38 = vld [vmem:[%s2286_s6 + $0x68] sm:$0xff] }
  0x37   : > { %1454 = vmatmul.mubr.msk.f32.gmra.mxu0 %vm535_vm0, %v424_v15  ;;  %507 = vperm.xlu1 %1531, %v449_v16   ;;  %v432_v39 = vld [vmem:[%s2283_s3 + $0x48] sm:$0xff]  ;;  %v803_v40 = vld [vmem:[%s2286_s6 + $0x50] sm:$0xff]  ;;  %v804_v41 = vld [vmem:[%s2286_s6 + $0x58] sm:$0xff] }
  0x38   : > { %660 = vmatprep.mubr.f32.mxu0 %v1644_v4  ;;  %512 = vperm.xlu0 %1530, %v450_v17   ;;  %v433_v42 = vld [vmem:[%s2283_s3 + $0x50] sm:$0xff]  ;;  %v801_v43 = vld [vmem:[%s2286_s6 + $0x40] sm:$0xff]  ;;  %v802_v44 = vld [vmem:[%s2286_s6 + $0x48] sm:$0xff] }
  0x39   : > { %v434_v45 = vld [vmem:[%s2283_s3 + $0x58] sm:$0xff]  ;;  %v799_v46 = vld [vmem:[%s2286_s6 + $0x30] sm:$0xff]  ;;  %v435_v48 = vld [vmem:[%s2283_s3 + $0x60] sm:$0xff] }
  0x3a   : > { %v800_v47 = vld [vmem:[%s2286_s6 + $0x38] sm:$0xff]  ;;  %v797_v49 = vld [vmem:[%s2286_s6 + $0x20] sm:$0xff]  ;;  %v798_v50 = vld [vmem:[%s2286_s6 + $0x28] sm:$0xff] }
  0x3b   : > { %1455 = vmatmul.mubr.msk.f32.gmra.mxu0 %vm535_vm0, %v425_v18  ;;  %497 = vperm.xlu1 %1531, %v447_v19   ;;  %v436_v51 = vld [vmem:[%s2283_s3 + $0x68] sm:$0xff]  ;;  %v795_v52 = vld [vmem:[%s2286_s6 + $0x10] sm:$0xff]  ;;  %v796_v53 = vld [vmem:[%s2286_s6 + $0x18] sm:$0xff] }
  0x3c   : > { %666 = vmatprep.mubr.f32.mxu0 %v1644_v4  ;;  %502 = vperm.xlu0 %1530, %v448_v20   ;;  %v437_v54 = vld [vmem:[%s2283_s3 + $0x70] sm:$0xff]  ;;  %v793_v55 = vld [vmem:[%s2286_s6] sm:$0xff]  ;;  %v794_v56 = vld [vmem:[%s2286_s6 + $0x8] sm:$0xff] }
  0x3d   : > { %v438_v57 = vld [vmem:[%s2283_s3 + $0x78] sm:$0xff]  ;;  %v422_v59 = vld [vmem:[%s2298_s2 + $0x8] sm:$0xff]  ;;  %v1088_v60 = vld [vmem:[%s2288_s8 + $0x10] sm:$0xff] }
  0x3e   : > { %v1089_v58 = vld [vmem:[%s2288_s8 + $0x18] sm:$0xff]  ;;  %v421_v61 = vld [vmem:[%s2298_s2] sm:$0xff]  ;;  %v1218_v62 = vsub.f32 1.0, %v422_v59  ;;  %v1087_v0 = vld [vmem:[%s2288_s8 + $0x8] sm:$0xff]  ;;  %s1558_s2 = scalar_lea.vmem %s1557_s1, 1024 }
  0x3f   : > { %1456 = vmatmul.mubr.msk.f32.gmra.mxu0 %vm535_vm0, %v426_v21  ;;  %487 = vperm.xlu1 %1531, %v445_v22   ;;  %v1217_v63 = vsub.f32 1.0, %v421_v61  ;;  %v1086_v1 = vld [vmem:[%s2288_s8] sm:$0xff]  ;;  %p1560_p4 = scmp.lt.s32.totalorder %s1558_s2, %s1552_s26 }
  0x40   : > { %672 = vmatprep.mubr.f32.mxu0 %v1644_v4  ;;  %492 = vperm.xlu0 %1530, %v446_v23  }
  0x41   : > { %p1561_p5 = por %p1560_p4, %p1559_p3 }
  0x43   : > { %1457 = vmatmul.mubr.msk.f32.gmra.mxu0 %vm535_vm0, %v427_v24  ;;  %477 = vperm.xlu1 %1531, %v443_v25   ;;  %p1562_p7 = pnand %p1561_p5, %p1555_p2 }
  0x44   : > { %678 = vmatprep.mubr.f32.mxu0 %v1644_v4  ;;  %482 = vperm.xlu0 %1530, %v444_v26  }
  0x47   : > { %1458 = vmatmul.mubr.msk.f32.gmra.mxu0 %vm535_vm0, %v428_v27  ;;  %467 = vperm.xlu1 %1531, %v441_v28  }
  0x48   : > { %684 = vmatprep.mubr.f32.mxu0 %v1644_v4  ;;  %472 = vperm.xlu0 %1530, %v442_v29  }
  0x4b   : > { %1459 = vmatmul.mubr.msk.f32.gmra.mxu0 %vm535_vm0, %v429_v30  ;;  %457 = vperm.xlu1 %1531, %v439_v31  }
  0x4c   : > { %690 = vmatprep.mubr.f32.mxu0 %v1644_v4  ;;  %462 = vperm.xlu0 %1530, %v440_v32  }
  0x4f   : > { %1460 = vmatmul.mubr.msk.f32.gmra.mxu0 %vm535_vm0, %v430_v33  ;;  %881 = vperm.xlu1 %1531, %v807_v34  }
  0x50   : > { %696 = vmatprep.mubr.f32.mxu0 %v1644_v4  ;;  %886 = vperm.xlu0 %1530, %v808_v35  }
  0x53   : > { %1461 = vmatmul.mubr.msk.f32.gmra.mxu0 %vm535_vm0, %v431_v36  ;;  %871 = vperm.xlu1 %1531, %v805_v37  }
  0x54   : > { %702 = vmatprep.mubr.f32.mxu0 %v1644_v4  ;;  %876 = vperm.xlu0 %1530, %v806_v38  }
  0x57   : > { %1462 = vmatmul.mubr.msk.f32.gmra.mxu0 %vm535_vm0, %v432_v39  ;;  %861 = vperm.xlu1 %1531, %v803_v40  }
  0x58   : > { %708 = vmatprep.mubr.f32.mxu0 %v1644_v4  ;;  %866 = vperm.xlu0 %1530, %v804_v41  }
  0x5b   : > { %1463 = vmatmul.mubr.msk.f32.gmra.mxu0 %vm535_vm0, %v433_v42  ;;  %851 = vperm.xlu1 %1531, %v801_v43  }
  0x5c   : > { %714 = vmatprep.mubr.f32.mxu0 %v1644_v4  ;;  %856 = vperm.xlu0 %1530, %v802_v44  }
  0x5f   : > { %1464 = vmatmul.mubr.msk.f32.gmra.mxu0 %vm535_vm0, %v434_v45  ;;  %841 = vperm.xlu1 %1531, %v799_v46  }
  0x60   : > { %720 = vmatprep.mubr.f32.mxu0 %v1644_v4  ;;  %846 = vperm.xlu0 %1530, %v800_v47  }
  0x63   : > { %1465 = vmatmul.mubr.msk.f32.gmra.mxu0 %vm535_vm0, %v435_v48  ;;  %831 = vperm.xlu1 %1531, %v797_v49  }
  0x64   : > { %726 = vmatprep.mubr.f32.mxu0 %v1644_v4  ;;  %836 = vperm.xlu0 %1530, %v798_v50  }
  0x67   : > { %1466 = vmatmul.mubr.msk.f32.gmra.mxu0 %vm535_vm0, %v436_v51  ;;  %821 = vperm.xlu1 %1531, %v795_v52  }
  0x68   : > { %732 = vmatprep.mubr.f32.mxu0 %v1644_v4  ;;  %826 = vperm.xlu0 %1530, %v796_v53  }
  0x6b   : > { %1467 = vmatmul.mubr.msk.f32.gmra.mxu0 %vm535_vm0, %v437_v54  ;;  %811 = vperm.xlu1 %1531, %v793_v55  }
  0x6c   : > { %738 = vmatprep.mubr.f32.mxu0 %v1644_v4  ;;  %816 = vperm.xlu0 %1530, %v794_v56  }
  0x6f   : > { %1468 = vmatmul.mubr.msk.f32.gmra.mxu0 %vm535_vm0, %v438_v57  ;;  %1107 = vperm.xlu1 %1531, %v1089_v58  }
  0x70   : > { %1174 = vmatprep.mubr.f32.mxu0 %v1644_v4  ;;  %1102 = vperm.xlu0 %1530, %v1088_v60  }
  0x73   : > { %1242 = vperm.xlu1 %1531, %v1218_v62  }
  0x74   : > { %1237 = vperm.xlu0 %1530, %v1217_v63  }
  0x77   : > { %1097 = vperm.xlu1 %1531, %v1087_v0  }
  0x78   : > { %1092 = vperm.xlu0 %1530, %v1086_v1  }
  0x7b   : > { %1210 = vperm.xlu1 %1531, %v422_v59  }
  0x7c   : > { %1205 = vperm.xlu0 %1530, %v421_v61  }
  0xaa   : > { %v523_v28 = vpop.permute.xlu1 %522 }
  0xab   : > { %v533_v26 = vpop.permute.xlu0 %532 }
  0xae   : > { %v518_v33 = vpop.permute.xlu1 %517 }
  0xaf   : > { %v528_v31 = vpop.permute.xlu0 %527 }
  0xb2   : > { %v508_v38 = vpop.permute.xlu1 %507 }
  0xb3   : > { %v513_v36 = vpop.permute.xlu0 %512 }
  0xb6   : > { %v498_v46 = vpop.permute.xlu1 %497 }
  0xb7   : > { %v503_v42 = vpop.permute.xlu0 %502 }
  0xba   : > { %v488_v60 = vpop.permute.xlu1 %487 }
  0xbb   : > { %v493_v55 = vpop.permute.xlu0 %492 }
  0xf3   : > { %v1970_v2 = vpop.f32.mrf.mxu0 }
  0xf5   : > { %v1972_v3 = vpop.f32.mrf.mxu0 }
  0xf7   : > { %v1974_v5 = vpop.f32.mrf.mxu0 }
  0xf9   : > { %v1976_v6 = vpop.f32.mrf.mxu0 }
  0xfb   : > { %v1978_v7 = vpop.f32.mrf.mxu0 }
  0xfd   : > { %v1980_v8 = vpop.f32.mrf.mxu0 }
  0xff   : > { %v1982_v9 = vpop.f32.mrf.mxu0 }
 0x101   : > { %v1984_v10 = vpop.f32.mrf.mxu0 }
 0x103   : > { %v1986_v11 = vpop.f32.mrf.mxu0 }
 0x105   : > { %v1988_v12 = vpop.f32.mrf.mxu0 }
 0x107   : > { %v1990_v13 = vpop.f32.mrf.mxu0 }
 0x109   : > { %v1992_v14 = vpop.f32.mrf.mxu0 }
 0x10b   : > { %v1994_v15 = vpop.f32.mrf.mxu0 }
 0x10d   : > { %v1996_v16 = vpop.f32.mrf.mxu0 }
 0x10f   : > { %v1998_v17 = vpop.f32.mrf.mxu0 }
 0x111   : > { %v2000_v18 = vpop.f32.mrf.mxu0 }
 0x113   : > { %v698_v19 = vpop.f32.mrf.mxu0 }
 0x115   : > { %v700_v20 = vpop.f32.mrf.mxu0 }
 0x117   : > { %v704_v21 = vpop.f32.mrf.mxu0 }
 0x119   : > { %v706_v22 = vpop.f32.mrf.mxu0 }
 0x11a   : > { %v707_v1 = vadd.f32 %v706_v22, %v503_v42 }
 0x11b   : > { %v710_v23 = vpop.f32.mrf.mxu0 }
 0x11c   : > { %v711_v63 = vadd.f32 %v710_v23, %v508_v38  ;;  %v693_v23 = vadd.f32 %v1998_v17, %v493_v55 }
 0x11d   : > { %v712_v24 = vpop.f32.mrf.mxu0 }
 0x11e   : > { %v713_v61 = vadd.f32 %v712_v24, %v508_v38  ;;  %v695_v24 = vadd.f32 %v2000_v18, %v493_v55  ;;  %v780_v55 = vld [vmem:[%s2285_s5 + $0x18] sm:$0xff] }
 0x11f   : > { %v716_v25 = vpop.f32.mrf.mxu0 }
 0x120   : > { %v717_v58 = vadd.f32 %v716_v25, %v513_v36  ;;  %v699_v25 = vadd.f32 %v698_v19, %v498_v46  ;;  %v760_v38 = vmax.f32 %v695_v24, 0.0 }
 0x121   : > { %v718_v27 = vpop.f32.mrf.mxu0 }
 0x122   : > { %v719_v56 = vadd.f32 %v718_v27, %v513_v36  ;;  %v701_v27 = vadd.f32 %v700_v20, %v498_v46  ;;  %v687_v20 = vadd.f32 %v1994_v15, %v488_v60  ;;  %v761_v36 = vmax.f32 %v699_v25, 0.0 }
 0x123   : > { %v722_v29 = vpop.f32.mrf.mxu0 }
 0x124   : > { %v723_v53 = vadd.f32 %v722_v29, %v518_v33  ;;  %v767_v29 = vmax.f32 %v717_v58, 0.0  ;;  %v783_v58 = vld [vmem:[%s2285_s5 + $0x30] sm:$0xff] }
 0x125   : > { %v724_v30 = vpop.f32.mrf.mxu0 }
 0x126   : > { %v725_v51 = vadd.f32 %v724_v30, %v518_v33  ;;  %v769_v0 = vmax.f32 %v723_v53, 0.0  ;;  %v483_v30 = vpop.permute.xlu0 %482  ;;  %v478_v33 = vpop.permute.xlu1 %477 }
 0x127   : > { %v728_v32 = vpop.f32.mrf.mxu0  ;;  %v681_v18 = vadd.f32 %v1990_v13, %v483_v30 }
 0x128   : > { %v729_v49 = vadd.f32 %v728_v32, %v523_v28  ;;  %v770_v62 = vmax.f32 %v725_v51, 0.0  ;;  %v765_v32 = vmax.f32 %v711_v63, 0.0  ;;  %v788_v63 = vld [vmem:[%s2285_s5 + $0x58] sm:$0xff] }
 0x129   : > { %v730_v34 = vpop.f32.mrf.mxu0 }
 0x12a   : > { %v731_v47 = vadd.f32 %v730_v34, %v523_v28  ;;  %v771_v59 = vmax.f32 %v729_v49, 0.0  ;;  %v705_v28 = vadd.f32 %v704_v21, %v503_v42  ;;  %v764_v34 = vmax.f32 %v707_v1, 0.0  ;;  %v473_v19 = vpop.permute.xlu0 %472  ;;  %v468_v17 = vpop.permute.xlu1 %467  ;;  %v790_v1 = vld [vmem:[%s2285_s5 + $0x68] sm:$0xff] }
 0x12b   : > { %v734_v35 = vpop.f32.mrf.mxu0  ;;  %v689_v21 = vadd.f32 %v1996_v16, %v488_v60  ;;  %v675_v16 = vadd.f32 %v1986_v11, %v478_v33  ;;  %v757_v42 = vmax.f32 %v687_v20, 0.0  ;;  %v671_v15 = vadd.f32 %v1984_v10, %v473_v19  ;;  %v785_v60 = vld [vmem:[%s2285_s5 + $0x40] sm:$0xff] }
 0x12c   : > { %v735_v45 = vadd.f32 %v734_v35, %v528_v31  ;;  %v772_v57 = vmax.f32 %v731_v47, 0.0  ;;  %v763_v22 = vmax.f32 %v705_v28, 0.0  ;;  %v762_v35 = vmax.f32 %v701_v27, 0.0  ;;  %v792_v28 = vld [vmem:[%s2285_s5 + $0x78] sm:$0xff] }
 0x12d   : > { %v736_v37 = vpop.f32.mrf.mxu0  ;;  %v753_v47 = vmax.f32 %v675_v16, 0.0  ;;  %v752_v49 = vmax.f32 %v671_v15, 0.0 }
 0x12e   : > { %v737_v43 = vadd.f32 %v736_v37, %v528_v31  ;;  %v773_v54 = vmax.f32 %v735_v45, 0.0  ;;  %v766_v31 = vmax.f32 %v713_v61, 0.0  ;;  %v683_v37 = vadd.f32 %v1992_v14, %v483_v30  ;;  %v463_v13 = vpop.permute.xlu0 %462  ;;  %v458_v11 = vpop.permute.xlu1 %457  ;;  %v786_v61 = vld [vmem:[%s2285_s5 + $0x48] sm:$0xff] }
 0x12f   : > { %v740_v39 = vpop.f32.mrf.mxu0  ;;  %v669_v14 = vadd.f32 %v1982_v9, %v473_v19  ;;  %v665_v45 = vadd.f32 %v1980_v8, %v468_v17  ;;  %v657_v10 = vadd.f32 %v1974_v5, %v463_v13  ;;  %v653_v9 = vadd.f32 %v1972_v3, %v458_v11  ;;  %v777_v5 = vld [vmem:[%s2285_s5] sm:$0xff]  ;;  %v779_v3 = vld [vmem:[%s2285_s5 + $0x10] sm:$0xff] }
 0x130   : > { %v741_v40 = vadd.f32 %v740_v39, %v533_v26  ;;  %v774_v52 = vmax.f32 %v737_v43, 0.0  ;;  %v759_v39 = vmax.f32 %v693_v23, 0.0  ;;  %v756_v43 = vmax.f32 %v683_v37, 0.0 }
 0x131   : > { %v742_v41 = vpop.f32.mrf.mxu0  ;;  %v750_v51 = vmax.f32 %v665_v45, 0.0  ;;  %v651_v8 = vadd.f32 %v1970_v2, %v458_v11  ;;  %v747_v53 = vmax.f32 %v657_v10, 0.0  ;;  %v778_v2 = vld [vmem:[%s2285_s5 + $0x8] sm:$0xff] }
 0x132   : > { %v743_v44 = vadd.f32 %v742_v41, %v533_v26  ;;  %v775_v50 = vmax.f32 %v741_v40, 0.0  ;;  %v768_v26 = vmax.f32 %v719_v56, 0.0  ;;  %v677_v40 = vadd.f32 %v1988_v12, %v478_v33  ;;  %v781_v56 = vld [vmem:[%s2285_s5 + $0x20] sm:$0xff]  ;;  %v887_v16 = vpop.permute.xlu0 %886  ;;  %v882_v15 = vpop.permute.xlu1 %881 }
 0x133   : > { %v758_v41 = vmax.f32 %v689_v21, 0.0  ;;  %v663_v12 = vadd.f32 %v1978_v7, %v468_v17 }
 0x134   : > { %v776_v48 = vmax.f32 %v743_v44, 0.0  ;;  %v755_v44 = vmax.f32 %v681_v18, 0.0  ;;  %v754_v46 = vmax.f32 %v677_v40, 0.0 }
 0x136   : > { %889 = vmatprep.subr.mxu1 %v776_v48  ;;  %v659_v48 = vadd.f32 %v1976_v6, %v463_v13  ;;  %v745_v6 = vmax.f32 %v651_v8, 0.0  ;;  %v872_v45 = vpop.permute.xlu1 %871 }
 0x137   : > { %890 = vmatpush1.msra.mxu1 %v775_v50  ;;  %v751_v50 = vmax.f32 %v669_v14, 0.0 }
 0x138   : > { %891 = vmatprep.subr.mxu1 %v774_v52  ;;  %v749_v52 = vmax.f32 %v663_v12, 0.0  ;;  %v748_v7 = vmax.f32 %v659_v48, 0.0 }
 0x139   : > { %892 = vmatpush1.msra.mxu1 %v773_v54  ;;  %v746_v54 = vmax.f32 %v653_v9, 0.0 }
 0x13a   : > { %893 = vmatprep.subr.mxu1 %v772_v57  ;;  %v782_v57 = vld [vmem:[%s2285_s5 + $0x28] sm:$0xff]  ;;  %v862_v48 = vpop.permute.xlu1 %861 }
 0x13b   : > { %894 = vmatpush1.msra.mxu1 %v771_v59  ;;  %v784_v59 = vld [vmem:[%s2285_s5 + $0x38] sm:$0xff] }
 0x13c   : > { %895 = vmatprep.subr.mxu1 %v770_v62  ;;  %v787_v62 = vld [vmem:[%s2285_s5 + $0x50] sm:$0xff] }
 0x13d   : > { %896 = vmatpush1.msra.mxu1 %v769_v0  ;;  %v789_v0 = vld [vmem:[%s2285_s5 + $0x60] sm:$0xff] }
 0x13e   : > { %897 = vmatprep.subr.mxu1 %v768_v26  ;;  %v791_v26 = vld [vmem:[%s2285_s5 + $0x70] sm:$0xff] }
 0x13f   : > { %898 = vmatpush1.msra.mxu1 %v767_v29 }
 0x140   : > { %899 = vmatprep.subr.mxu1 %v766_v31 }
 0x141   : > { %900 = vmatpush1.msra.mxu1 %v765_v32 }
 0x142   : > { %901 = vmatprep.subr.mxu1 %v764_v34 }
 0x143   : > { %902 = vmatpush1.msra.mxu1 %v763_v22 }
 0x144   : > { %903 = vmatprep.subr.mxu1 %v762_v35 }
 0x145   : > { %904 = vmatpush1.msra.mxu1 %v761_v36 }
 0x146   : > { %905 = vmatprep.subr.mxu1 %v760_v38 }
 0x147   : > { %906 = vmatpush1.msra.mxu1 %v759_v39 }
 0x148   : > { %907 = vmatprep.subr.mxu1 %v758_v41 }
 0x149   : > { %908 = vmatpush1.msra.mxu1 %v757_v42 }
 0x14a   : > { %909 = vmatprep.subr.mxu1 %v756_v43 }
 0x14b   : > { %910 = vmatpush1.msra.mxu1 %v755_v44  ;;  %v877_v44 = vpop.permute.xlu0 %876 }
 0x14c   : > { %911 = vmatprep.subr.mxu1 %v754_v46 }
 0x14d   : > { %912 = vmatpush1.msra.mxu1 %v753_v47 }
 0x14e   : > { %913 = vmatprep.subr.mxu1 %v752_v49 }
 0x14f   : > { %914 = vmatpush1.msra.mxu1 %v751_v50  ;;  %v867_v47 = vpop.permute.xlu0 %866 }
 0x150   : > { %915 = vmatprep.subr.mxu1 %v750_v51 }
 0x151   : > { %916 = vmatpush1.msra.mxu1 %v749_v52 }
 0x152   : > { %917 = vmatprep.subr.mxu1 %v748_v7 }
 0x153   : > { %918 = vmatpush1.msra.mxu1 %v747_v53  ;;  %v857_v8 = vpop.permute.xlu0 %856 }
 0x154   : > { %919 = vmatprep.subr.mxu1 %v746_v54  ;;  %v852_v54 = vpop.permute.xlu1 %851 }
 0x155   : > { %920 = vmatpush1.msra.mxu1 %v745_v6 }
 0x156   : > { %954 = vmatmul.mubr.f32.vlgmr.msra.gmra.mxu1 %v777_v5 }
 0x157   : > { %959 = vmatprep.mubr.f32.mxu1 %v1644_v4 }
 0x15a   : > { %960 = vmatmul.mubr.f32.gmra.mxu1 %v778_v2 }
 0x15b   : > { %965 = vmatprep.mubr.f32.mxu1 %v1644_v4 }
 0x15e   : > { %966 = vmatmul.mubr.f32.gmra.mxu1 %v779_v3 }
 0x15f   : > { %971 = vmatprep.mubr.f32.mxu1 %v1644_v4 }
 0x162   : > { %972 = vmatmul.mubr.f32.gmra.mxu1 %v780_v55 }
 0x163   : > { %977 = vmatprep.mubr.f32.mxu1 %v1644_v4 }
 0x166   : > { %978 = vmatmul.mubr.f32.gmra.mxu1 %v781_v56 }
 0x167   : > { %983 = vmatprep.mubr.f32.mxu1 %v1644_v4 }
 0x16a   : > { %984 = vmatmul.mubr.f32.gmra.mxu1 %v782_v57 }
 0x16b   : > { %989 = vmatprep.mubr.f32.mxu1 %v1644_v4 }
 0x16e   : > { %990 = vmatmul.mubr.f32.gmra.mxu1 %v783_v58 }
 0x16f   : > { %995 = vmatprep.mubr.f32.mxu1 %v1644_v4 }
 0x172   : > { %996 = vmatmul.mubr.f32.gmra.mxu1 %v784_v59  ;;  %v847_v59 = vpop.permute.xlu0 %846 }
 0x173   : > { %1001 = vmatprep.mubr.f32.mxu1 %v1644_v4 }
 0x176   : > { %1002 = vmatmul.mubr.f32.gmra.mxu1 %v785_v60 }
 0x177   : > { %1007 = vmatprep.mubr.f32.mxu1 %v1644_v4 }
 0x17a   : > { %1008 = vmatmul.mubr.f32.gmra.mxu1 %v786_v61 }
 0x17b   : > { %1013 = vmatprep.mubr.f32.mxu1 %v1644_v4 }
 0x17e   : > { %1014 = vmatmul.mubr.f32.gmra.mxu1 %v787_v62 }
 0x17f   : > { %1019 = vmatprep.mubr.f32.mxu1 %v1644_v4 }
 0x182   : > { %1020 = vmatmul.mubr.f32.gmra.mxu1 %v788_v63 }
 0x183   : > { %1025 = vmatprep.mubr.f32.mxu1 %v1644_v4 }
 0x186   : > { %1026 = vmatmul.mubr.f32.gmra.mxu1 %v789_v0  ;;  %v842_v0 = vpop.permute.xlu1 %841 }
 0x187   : > { %1031 = vmatprep.mubr.f32.mxu1 %v1644_v4 }
 0x18a   : > { %1032 = vmatmul.mubr.f32.gmra.mxu1 %v790_v1 }
 0x18b   : > { %1037 = vmatprep.mubr.f32.mxu1 %v1644_v4 }
 0x18e   : > { %1038 = vmatmul.mubr.f32.gmra.mxu1 %v791_v26 }
 0x18f   : > { %1043 = vmatprep.mubr.f32.mxu1 %v1644_v4 }
 0x192   : > { %1044 = vmatmul.mubr.f32.gmra.mxu1 %v792_v28 }
 0x216   : > { %v2081_v29 = vpop.f32.mrf.mxu1 }
 0x218   : > { %v2083_v30 = vpop.f32.mrf.mxu1 }
 0x21a   : > { %v2085_v27 = vpop.f32.mrf.mxu1 }
 0x21c   : > { %v2087_v31 = vpop.f32.mrf.mxu1 }
 0x21e   : > { %v2089_v25 = vpop.f32.mrf.mxu1 }
 0x220   : > { %v2091_v32 = vpop.f32.mrf.mxu1 }
 0x222   : > { %v2093_v33 = vpop.f32.mrf.mxu1 }
 0x224   : > { %v2095_v24 = vpop.f32.mrf.mxu1 }
 0x226   : > { %v2097_v34 = vpop.f32.mrf.mxu1 }
 0x228   : > { %v2099_v23 = vpop.f32.mrf.mxu1 }
 0x22a   : > { %v2101_v22 = vpop.f32.mrf.mxu1 }
 0x22c   : > { %v2103_v21 = vpop.f32.mrf.mxu1 }
 0x22e   : > { %v2105_v35 = vpop.f32.mrf.mxu1 }
 0x230   : > { %v2107_v20 = vpop.f32.mrf.mxu1 }
 0x232   : > { %v2109_v36 = vpop.f32.mrf.mxu1 }
 0x234   : > { %v2111_v19 = vpop.f32.mrf.mxu1 }
 0x236   : > { %v1003_v37 = vpop.f32.mrf.mxu1 }
 0x238   : > { %v1005_v38 = vpop.f32.mrf.mxu1 }
 0x23a   : > { %v1009_v18 = vpop.f32.mrf.mxu1 }
 0x23c   : > { %v1011_v39 = vpop.f32.mrf.mxu1 }
 0x23d   : > { %v1012_v28 = vadd.f32 %v1011_v39, %v857_v8 }
 0x23e   : > { %v1015_v17 = vpop.f32.mrf.mxu1 }
 0x23f   : > { %v1016_v1 = vadd.f32 %v1015_v17, %v862_v48  ;;  %v832_v17 = vpop.permute.xlu1 %831 }
 0x240   : > { %v1017_v40 = vpop.f32.mrf.mxu1 }
 0x241   : > { %v1018_v62 = vadd.f32 %v1017_v40, %v862_v48  ;;  %v1000_v40 = vadd.f32 %v2111_v19, %v847_v59 }
 0x242   : > { %v1021_v41 = vpop.f32.mrf.mxu1 }
 0x243   : > { %v1022_v60 = vadd.f32 %v1021_v41, %v867_v47  ;;  %v1004_v41 = vadd.f32 %v1003_v37, %v852_v54 }
 0x244   : > { %v1023_v42 = vpop.f32.mrf.mxu1 }
 0x245   : > { %v1024_v57 = vadd.f32 %v1023_v42, %v867_v47  ;;  %v1006_v42 = vadd.f32 %v1005_v38, %v852_v54  ;;  %v992_v38 = vadd.f32 %v2105_v35, %v842_v0  ;;  %v1066_v47 = vmax.f32 %v1004_v41, 0.0 }
 0x246   : > { %v1027_v43 = vpop.f32.mrf.mxu1 }
 0x247   : > { %v1028_v55 = vadd.f32 %v1027_v43, %v872_v45  ;;  %v1072_v43 = vmax.f32 %v1022_v60, 0.0 }
 0x248   : > { %v1029_v14 = vpop.f32.mrf.mxu1 }
 0x249   : > { %v1030_v2 = vadd.f32 %v1029_v14, %v872_v45  ;;  %v1074_v26 = vmax.f32 %v1028_v55, 0.0  ;;  %v1071_v14 = vmax.f32 %v1018_v62, 0.0  ;;  %v1069_v45 = vmax.f32 %v1012_v28, 0.0 }
 0x24a   : > { %v1033_v13 = vpop.f32.mrf.mxu1 }
 0x24b   : > { %v1034_v6 = vadd.f32 %v1033_v13, %v877_v44  ;;  %v1075_v63 = vmax.f32 %v1030_v2, 0.0  ;;  %v1070_v13 = vmax.f32 %v1016_v1, 0.0 }
 0x24c   : > { %v1035_v46 = vpop.f32.mrf.mxu1 }
 0x24d   : > { %v1036_v7 = vadd.f32 %v1035_v46, %v877_v44  ;;  %v1076_v61 = vmax.f32 %v1034_v6, 0.0  ;;  %v837_v44 = vpop.permute.xlu0 %836  ;;  %v998_v46 = vadd.f32 %v2109_v36, %v847_v59  ;;  %v982_v36 = vadd.f32 %v2099_v23, %v832_v17 }
 0x24e   : > { %v1039_v12 = vpop.f32.mrf.mxu1  ;;  %v988_v37 = vadd.f32 %v2103_v21, %v837_v44  ;;  %v986_v48 = vadd.f32 %v2101_v22, %v837_v44 }
 0x24f   : > { %v1040_v52 = vadd.f32 %v1039_v12, %v882_v15  ;;  %v1077_v58 = vmax.f32 %v1036_v7, 0.0  ;;  %v1067_v12 = vmax.f32 %v1006_v42, 0.0 }
 0x250   : > { %v1041_v11 = vpop.f32.mrf.mxu1 }
 0x251   : > { %v1042_v9 = vadd.f32 %v1041_v11, %v882_v15  ;;  %v1078_v56 = vmax.f32 %v1040_v52, 0.0  ;;  %v1010_v15 = vadd.f32 %v1009_v18, %v857_v8  ;;  %v994_v18 = vadd.f32 %v2107_v20, %v842_v0  ;;  %v827_v19 = vpop.permute.xlu0 %826  ;;  %v822_v20 = vpop.permute.xlu1 %821 }
 0x252   : > { %v1045_v49 = vpop.f32.mrf.mxu1  ;;  %v1065_v11 = vmax.f32 %v1000_v40, 0.0  ;;  %v976_v35 = vadd.f32 %v2095_v24, %v827_v19  ;;  %v974_v21 = vadd.f32 %v2093_v33, %v827_v19  ;;  %v1060_v8 = vmax.f32 %v986_v48, 0.0 }
 0x253   : > { %v1046_v10 = vadd.f32 %v1045_v49, %v887_v16  ;;  %v1079_v3 = vmax.f32 %v1042_v9, 0.0  ;;  %v1068_v39 = vmax.f32 %v1010_v15, 0.0  ;;  %v1064_v49 = vmax.f32 %v998_v46, 0.0 }
 0x254   : > { %v1047_v50 = vpop.f32.mrf.mxu1  ;;  %v1062_v9 = vmax.f32 %v992_v38, 0.0  ;;  %v970_v22 = vadd.f32 %v2091_v32, %v822_v20  ;;  %v1059_v52 = vmax.f32 %v982_v36, 0.0  ;;  %v968_v7 = vadd.f32 %v2089_v25, %v822_v20 }
 0x255   : > { %v1048_v51 = vadd.f32 %v1047_v50, %v887_v16  ;;  %v1080_v5 = vmax.f32 %v1046_v10, 0.0  ;;  %v1073_v16 = vmax.f32 %v1024_v57, 0.0  ;;  %v1063_v10 = vmax.f32 %v994_v18, 0.0  ;;  %v817_v23 = vpop.permute.xlu0 %816  ;;  %v812_v24 = vpop.permute.xlu1 %811  ;;  %v1085_v57 = vld [vmem:[%s2287_s7 + $0x18] sm:$0xff] }
 0x256   : > { %v980_v50 = vadd.f32 %v2097_v34, %v832_v17  ;;  %v964_v34 = vadd.f32 %v2087_v31, %v817_v23  ;;  %v1057_v54 = vmax.f32 %v976_v35, 0.0  ;;  %v962_v6 = vadd.f32 %v2085_v27, %v817_v23  ;;  %v1082_v27 = vld [vmem:[%s2287_s7] sm:$0xff] }
 0x257   : > { %v1081_v53 = vmax.f32 %v1048_v51, 0.0  ;;  %v1061_v51 = vmax.f32 %v988_v37, 0.0  ;;  %v958_v33 = vadd.f32 %v2083_v30, %v812_v24  ;;  %v1055_v2 = vmax.f32 %v970_v22, 0.0  ;;  %v1084_v30 = vld [vmem:[%s2287_s7 + $0x10] sm:$0xff] }
 0x258   : > { %v956_v32 = vadd.f32 %v2081_v29, %v812_v24  ;;  %v1053_v25 = vmax.f32 %v964_v34, 0.0  ;;  %v1052_v55 = vmax.f32 %v962_v6, 0.0  ;;  %v1083_v29 = vld [vmem:[%s2287_s7 + $0x8] sm:$0xff]  ;;  %v1282_v35 = vlaneseq }
 0x259   : > { %1110 = vmatprep.subr.mxu0 %v1081_v53  ;;  %v1058_v53 = vmax.f32 %v980_v50, 0.0  ;;  %v1051_v31 = vmax.f32 %v958_v33, 0.0  ;;  %v1103_v62 = vpop.permute.xlu0 %1102  ;;  %v1108_v28 = vpop.permute.xlu1 %1107  ;;  %v1646_v50 = vmov 1966171168  }
 0x25a   : > { %1111 = vmatpush1.msra.mxu0 %v1080_v5  ;;  %v1056_v5 = vmax.f32 %v974_v21, 0.0  ;;  %vm2204_vm1 = vcmp.lt.s32.totalorder %v1282_v35, 256 }
 0x25b   : > { %1112 = vmatprep.subr.mxu0 %v1079_v3  ;;  %v1054_v3 = vmax.f32 %v968_v7, 0.0  ;;  %v1548_v7 = vld [vmem:[%s1770_s20] sm:$0xff] }
 0x25c   : > { %1113 = vmatpush1.msra.mxu0 %v1078_v56  ;;  %v1050_v56 = vmax.f32 %v956_v32, 0.0 }
 0x25d   : > { %1114 = vmatprep.subr.mxu0 %v1077_v58  ;;  %v2148_v40 = vpop.permute.xlu0 %1237 }
 0x25e   : > { %1115 = vmatpush1.msra.mxu0 %v1076_v61 }
 0x25f   : > { %1116 = vmatprep.subr.mxu0 %v1075_v63 }
 0x260   : > { %1117 = vmatpush1.msra.mxu0 %v1074_v26 }
 0x261   : > { %1118 = vmatprep.subr.mxu0 %v1073_v16  ;;  %v1093_v48 = vpop.permute.xlu0 %1092 }
 0x262   : > { %1119 = vmatpush1.msra.mxu0 %v1072_v43 }
 0x263   : > { %1120 = vmatprep.subr.mxu0 %v1071_v14 }
 0x264   : > { %1121 = vmatpush1.msra.mxu0 %v1070_v13 }
 0x265   : > { %1122 = vmatprep.subr.mxu0 %v1069_v45  ;;  %v2150_v45 = vpop.permute.xlu1 %1242 }
 0x266   : > { %1123 = vmatpush1.msra.mxu0 %v1068_v39 }
 0x267   : > { %1124 = vmatprep.subr.mxu0 %v1067_v12 }
 0x268   : > { %1125 = vmatpush1.msra.mxu0 %v1066_v47 }
 0x269   : > { %1126 = vmatprep.subr.mxu0 %v1065_v11  ;;  %v1098_v22 = vpop.permute.xlu1 %1097 }
 0x26a   : > { %1127 = vmatpush1.msra.mxu0 %v1064_v49 }
 0x26b   : > { %1128 = vmatprep.subr.mxu0 %v1063_v10 }
 0x26c   : > { %1129 = vmatpush1.msra.mxu0 %v1062_v9  ;;  %v1280_v9 = vunpack.c.l.s4 %v1646_v50 }
 0x26d   : > { %1130 = vmatprep.subr.mxu0 %v1061_v51 }
 0x26e   : > { %1131 = vmatpush1.msra.mxu0 %v1060_v8  ;;  %v1281_v6 = vunpack.c.0.s8 %v1280_v9 }
 0x26f   : > { %1132 = vmatprep.subr.mxu0 %v1059_v52  ;;  %v1206_v52 = vpop.permute.xlu0 %1205 }
 0x270   : > { %1133 = vmatpush1.msra.mxu0 %v1058_v53 }
 0x271   : > { %1134 = vmatprep.subr.mxu0 %v1057_v54 }
 0x272   : > { %1135 = vmatpush1.msra.mxu0 %v1056_v5  ;;  %v1283_v5 = vshrl.u32 %v1282_v35, 7 }
 0x273   : > { %1136 = vmatprep.subr.mxu0 %v1055_v2  ;;  %v1549_v2 = vld [vmem:[%s1770_s20 + $0x8] sm:$0xff] }
 0x274   : > { %1137 = vmatpush1.msra.mxu0 %v1054_v3 }
 0x275   : > { %1138 = vmatprep.subr.mxu0 %v1053_v25 }
 0x276   : > { %1139 = vmatpush1.msra.mxu0 %v1052_v55 }
 0x277   : > { %1140 = vmatprep.subr.mxu0 %v1051_v31  ;;  %v1213_v31 = vmul.f32 %v1548_v7, %v1206_v52 }
 0x278   : > { %1141 = vmatpush1.msra.mxu0 %v1050_v56 }
 0x279   : > { %1175 = vmatmul.mubr.f32.vlgmr.msra.gmra.mxu0 %v1082_v27  ;;  %v1550_v27 = vld [vmem:[%s1770_s20 + $0x10] sm:$0xff] }
 0x27a   : > { %1180 = vmatprep.mubr.f32.mxu0 %v1644_v4 }
 0x27d   : > { %1181 = vmatmul.mubr.f32.gmra.mxu0 %v1083_v29 }
 0x27e   : > { %1186 = vmatprep.mubr.f32.mxu0 %v1644_v4 }
 0x281   : > { %1187 = vmatmul.mubr.f32.gmra.mxu0 %v1084_v30 }
 0x282   : > { %1192 = vmatprep.mubr.f32.mxu0 %v1644_v4 }
 0x285   : > { %1193 = vmatmul.mubr.f32.gmra.mxu0 %v1085_v57 }
 0x339   : > { %v1176_v58 = vpop.f32.mrf.mxu0 }
 0x33a   : > { %v1177_v23 = vadd.f32 %v1176_v58, %v1093_v48 }
 0x33b   : > { %v1178_v59 = vpop.f32.mrf.mxu0 }
 0x33c   : > { %v1179_v33 = vadd.f32 %v1178_v59, %v1093_v48 }
 0x33d   : > { %v2144_v60 = vpop.f32.mrf.mxu0 }
 0x33e   : > { %v1183_v56 = vadd.f32 %v2144_v60, %v1098_v22  ;;  %v1284_v60 = vsub.s32 %v1281_v6, %v1283_v5 }
 0x33f   : > { %v2146_v61 = vpop.f32.mrf.mxu0 }
 0x341   : > { %v1188_v63 = vpop.f32.mrf.mxu0 }
 0x342   : > { %v1189_v0 = vadd.f32 %v1188_v63, %v1103_v62  ;;  %v1211_v63 = vpop.permute.xlu1 %1210 }
 0x343   : > { %v1190_v1 = vpop.f32.mrf.mxu0 }
 0x344   : > { %1532 = vtanh.f32 %v1189_v0  ;;  %v1191_v26 = vadd.f32 %v1190_v1, %v1103_v62  ;;  %v1214_v62 = vmul.f32 %v1549_v2, %v1206_v52  ;;  %v1185_v0 = vadd.f32 %v2146_v61, %v1098_v22 }
 0x345   : > { %v1194_v16 = vpop.f32.mrf.mxu0 }
 0x346   : > { %1534 = vtanh.f32 %v1191_v26  ;;  %v1195_v4 = vadd.f32 %v1194_v16, %v1108_v28  ;;  %v1551_v26 = vld [vmem:[%s1770_s20 + $0x18] sm:$0xff] }
 0x347   : > { %v1196_v15 = vpop.f32.mrf.mxu0 }
 0x348   : > { %1536 = vtanh.f32 %v1195_v4  ;;  %v1197_v43 = vadd.f32 %v1196_v15, %v1108_v28 }
 0x34a   : > { %1538 = vtanh.f32 %v1197_v43  ;;  %v1215_v43 = vmul.f32 %v1550_v27, %v1211_v63 }
 0x351   : > { %v1533_v42 = vpop.eup %1532 }
 0x352   : > { %v1219_v14 = vmul.f32 1.442695, %v1533_v42  ;;  %v1258_v17 = vmul.f32 %v1533_v42, %v2148_v40 }
 0x353   : > { %v1535_v44 = vpop.eup %1534 }
 0x354   : > { %1540 = vpow2.f32 %v1219_v14  ;;  %v1221_v41 = vmul.f32 1.442695, %v1535_v44  ;;  %v1259_v12 = vmul.f32 %v1535_v44, %v2148_v40 }
 0x355   : > { %v1537_v13 = vpop.eup %1536 }
 0x356   : > { %1542 = vpow2.f32 %v1221_v41  ;;  %v1223_v46 = vmul.f32 1.442695, %v1537_v13  ;;  %v1260_v39 = vmul.f32 %v1537_v13, %v2150_v45  ;;  %v1216_v13 = vmul.f32 %v1551_v26, %v1211_v63 }
 0x357   : > { %v1539_v18 = vpop.eup %1538 }
 0x358   : > { %1544 = vpow2.f32 %v1223_v46  ;;  %v1262_v38 = vadd.f32 %v1260_v39, %v1258_v17  ;;  %v1225_v47 = vmul.f32 1.442695, %v1539_v18  ;;  %v1261_v37 = vmul.f32 %v1539_v18, %v2150_v45  ;;  %v1257_v46 = vld [vmem:[%s413_s25] sm:$0x3]  ;;  %s2211_s25 = scalar_lea.hbm %s2290_s10, %s1479_s0 }
 0x35a   : > { %v1263_v11 = vrot.slane %v1262_v38, 4  ;;  %1546 = vpow2.f32 %v1225_v47  ;;  %v1269_v19 = vadd.f32 %v1261_v37, %v1259_v12 }
 0x35c   : > { %v1264_v49 = vadd.f32 %v1263_v11, %v1262_v38  ;;  %v1270_v36 = vrot.slane %v1269_v19, 4 }
 0x35e   : > { %v1271_v10 = vadd.f32 %v1270_v36, %v1269_v19  ;;  %v1265_v20 = vrot.slane %v1264_v49, 2 }
 0x360   : > { %v1266_v51 = vadd.f32 %v1265_v20, %v1264_v49  ;;  %v1272_v21 = vrot.slane %v1271_v10, 2 }
 0x361   : > { %v1541_v8 = vpop.eup %1540 }
 0x362   : > { %v1227_v53 = vmul.f32 %v1548_v7, %v1541_v8  ;;  %v1273_v34 = vadd.f32 %v1272_v21, %v1271_v10  ;;  %v1267_v24 = vrot.slane %v1266_v51, 1 }
 0x363   : > { %v1543_v54 = vpop.eup %1542 }
 0x364   : > { %v1228_v32 = vmul.f32 %v1549_v2, %v1543_v54  ;;  %v1231_v3 = vadd.f32 %v1227_v53, %v1177_v23  ;;  %v1274_v25 = vrot.slane %v1273_v34, 1  ;;  %v1268_v1 = vadd.f32 %v1267_v24, %v1266_v51 }
 0x365   : > { %v1545_v55 = vpop.eup %1544 }
 0x366   : > { %v1229_v29 = vmul.f32 %v1550_v27, %v1545_v55  ;;  %v1232_v30 = vadd.f32 %v1228_v32, %v1179_v33  ;;  %v1245_v57 = vmul.f32 %v2148_v40, %v1231_v3  ;;  %v1275_v58 = vadd.f32 %v1274_v25, %v1273_v34 }
 0x367   : > { %v1547_v59 = vpop.eup %1546 }
 0x368   : > { %v1230_v28 = vmul.f32 %v1551_v26, %v1547_v59  ;;  %v1233_v16 = vadd.f32 %v1229_v29, %v1183_v56  ;;  %v1246_v4 = vmul.f32 %v2148_v40, %v1232_v30  ;;  %v1249_v15 = vadd.f32 %v1245_v57, %v1213_v31 }
 0x369   : > { %v1278_v61 = vcombine.low %v1268_v1, %v1275_v58 }
 0x36a   : > { %v1234_v42 = vadd.f32 %v1230_v28, %v1185_v0  ;;  %v1247_v14 = vmul.f32 %v2150_v45, %v1233_v16  ;;  %v1250_v44 = vadd.f32 %v1246_v4, %v1214_v62  ;;  %1253 = vst [vmem:[%s2175_s28] sm:$0xff] %v1249_v15 }
 0x36b   : > { %v1285_v41 = vrot.slane %v1278_v61, %v1284_v60 }
 0x36c   : > { %v1248_v40 = vmul.f32 %v2150_v45, %v1234_v42  ;;  %v1251_v17 = vadd.f32 %v1247_v14, %v1215_v43  ;;  %1254 = vst [vmem:[%s2175_s28 + $0x8] sm:$0xff] %v1250_v44 }
 0x36d   : > { %v1292_v39 = vrot.slane %v1285_v41, %v1284_v60 }
 0x36e   : > { %v1252_v18 = vadd.f32 %v1248_v40, %v1216_v13  ;;  %1255 = vst [vmem:[%s2175_s28 + $0x10] sm:$0xff] %v1251_v17 }
 0x36f   : > { %v1294_v45 = vadd.f32 %v1292_v39, %v1257_v46 }
 0x370   : > { %1256 = vst [vmem:[%s2175_s28 + $0x18] sm:$0xff] %v1252_v18 }
 0x371   : > { %1565 = shalt.err (!%p1562_p7)
}
 0x372   : > { %s1566_s28 = scalar_lea.hbm %s2192_s27, 512  ;;  %s1570_s20 = scalar_lea.hbm %s2289_s9, 2048 }
 0x373   : > { %p1567_p9 = scmp.ne.s32.totalorder %s2192_s27, %s1566_s28  ;;  %p1571_p12 = scmp.lt.s32.totalorder %s2192_s27, %s2289_s9 }
 0x374   : > { %p1572_p13 = scmp.lt.s32.totalorder %s1570_s20, %s1566_s28 }
 0x375   : > { %p1568_p10 = pnand %p1567_p9, %p1746_p6 }
 0x376   : > { %p1573_p0 = por %p1572_p13, %p1571_p12 }
 0x377   : > { %p1569_p11 = pneg %p1568_p10 }
 0x379   : > { %p1574_p1 = pnand %p1573_p0, %p1569_p11 }
 0x37b   : > { %1577 = shalt.err (!%p1574_p1)
}
 0x37c   : > { %s1648_s1 = smov 256   ;;  %s1649_s2 = smov 1024   ;;  %1299 = vst.msk [vmem:[%s2199_s11] sm:$0x3] %vm2204_vm1, %v1294_v45 }
 0x37d   : > { %s1650_s26 = smov 16   ;;  %s2304_s17 = scalar_lea.sflag [#allocation4], %s1763_s12 }
 0x37e   : > { %1480 = dma.vmem_to_hbm [thread:$0]  (%p1746_p6), %s2187_s29, 512, %s2192_s27, %s2304_s17, %s1648_s1, %s1649_s2, %s1650_s26  }
 0x37f   : > { %s1306_s28 = scalar_lea.sflag [#allocation6], %s1763_s12  ;;  %s1578_s0 = scalar_lea.vmem %s2213_s21, 32 }
 0x380   : > { %p1579_p2 = scmp.ne.s32.totalorder %s2213_s21, %s1578_s0  ;;  %s1651_s30 = smov [#allocation5]  }
 0x381   : > { %s1582_s20 = sshll.u32 %s1651_s30, 4  ;;  %s1583_s20 = int_to_ptr.vmem [resolvable:$false] %s1582_s20 }
 0x382   : > { %p1580_p3 = pnand %p1579_p2, %p1746_p6  ;;  %s1584_s18 = scalar_lea.vmem %s1583_s20, 64 }
 0x383   : > { %p1585_p5 = scmp.lt.s32.totalorder %s2213_s21, %s1583_s20  ;;  %p1586_p7 = scmp.lt.s32.totalorder %s1584_s18, %s1578_s0 }
 0x384   : > { %p1581_p4 = pneg %p1580_p3 }
 0x385   : > { %p1587_p9 = por %p1586_p7, %p1585_p5 }
 0x387   : > { %p1588_p10 = pnand %p1587_p9, %p1581_p4 }
 0x389   : > { %1591 = shalt.err (!%p1588_p10)
}
 0x38a   : > { %s1592_s29 = scalar_lea.hbm %s2211_s25, 32  ;;  %s1596_s11 = scalar_lea.hbm %s2290_s10, 128 }
 0x38b   : > { %p1593_p11 = scmp.ne.s32.totalorder %s2211_s25, %s1592_s29  ;;  %p1597_p0 = scmp.lt.s32.totalorder %s2211_s25, %s2290_s10 }
 0x38c   : > { %p1598_p1 = scmp.lt.s32.totalorder %s1596_s11, %s1592_s29 }
 0x38d   : > { %p1594_p12 = pnand %p1593_p11, %p1746_p6 }
 0x38e   : > { %p1599_p2 = por %p1598_p1, %p1597_p0 }
 0x38f   : > { %p1595_p13 = pneg %p1594_p12 }
 0x391   : > { %p1600_p3 = pnand %p1599_p2, %p1595_p13 }
 0x393   : > { %1603 = shalt.err (!%p1600_p3)
}
 0x394   : > { %1481 = dma.vmem_to_hbm [thread:$0]  (%p1746_p6), %s2213_s21, 32, %s2211_s25, %s1306_s28  }
 0x395 PF: > { %p1491_p4 = scmp.ge.s32.totalorder %s1642_s16, 2  ;;  %s1348_s26 = sand.u32 1, %s1630_s13  }
 0x396   : > { %s1349_s17 = scalar_lea.sflag [#allocation4], %s1348_s26 }
 0x397   : > { %p1485_p5 = pnand %p1491_p4, %p1750_p8 }
 0x399   : > { %p1486_p7 = pneg %p1485_p5 }
 0x39b   : > { %1621 = dma.done.wait (%p1486_p7), %s1349_s17, 512  }
 0x39c   : > { %1623 = vsyncadd (%p1486_p7), %s1349_s17, 4294966784  ;;  %s1358_s0 = scalar_lea.sflag [#allocation6], %s1348_s26 }
 0x39d   : > { %1625 = dma.done.wait (%p1486_p7), %s1358_s0, 32  }
 0x39e   : > { %1627 = vsyncadd (%p1486_p7), %s1358_s0, 4294967264  ;;  %p24_p6 = scmp.ge.s32.totalorder %s1732_s19, 6   ;;  %s2305_s13 = smov %s1634_s14 }
 0x39f   : > { %s2306_s14 = smov %s1638_s15  ;;  %s2307_s15 = smov %s1744_s22 }
 0x3a0   : > { %s2308_s16 = smov %s1732_s19  ;;  %26 = sbr.rel (!%p24_p6) target bundleno = 9 (0x9), region = 139 }
 0x3a5   :  { %1363 = vsyncpa [#allocation4], 1 }
 0x3a6   :  { %1365 = vsyncpa [#allocation4 + $0x1], 1 }
 0x3a7   :  { %1366 = vsyncpa [#allocation6], 1 }
 0x3a8   :  { %1368 = vsyncpa [#allocation6 + $0x1], 1 }

</bundles_post_ra>
